<compile_context>
chip_gen: v7x
topology: tpu7x:2x2x1
jax: 0.10.0
libtpu: 0.0.40
codegen_flags: <defaults>
</compile_context>

<pallas_src>
import functools

import jax
import jax.numpy as jnp
from jax.experimental import pallas as pl
from jax.experimental.pallas import tpu as pltpu

LANE = 128  # TPU lane width: hidden feature dims are padded to a multiple.


def _round_up(n, m):
    return ((n + m - 1) // m) * m


# ---------------------------------------------------------------------------
# Pallas kernel: fused 2-hidden-layer MLP with tanh hidden nonlinearities.
# One grid step processes one (TB, D) batch tile; weights are VMEM-resident.
# ---------------------------------------------------------------------------
def fnn_kernel(x_ref, w1_ref, b1_ref, w2_ref, b2_ref, wo_ref, bo_ref, o_ref):
    # operand cast in-kernel (x streamed as f32, matmul operands may be bf16)
    x = x_ref[...].astype(w1_ref.dtype)
    # hidden layer 1: Linear + tanh (MXU matmul, f32 accumulate, EUP tanh)
    h = jnp.dot(x, w1_ref[...], preferred_element_type=jnp.float32)
    h = jnp.tanh(h + b1_ref[...])
    # hidden layer 2: Linear + tanh
    h = jnp.dot(h.astype(w2_ref.dtype), w2_ref[...],
                preferred_element_type=jnp.float32)
    h = jnp.tanh(h + b2_ref[...])
    # output layer: Linear (output_nonlin=None in this configuration)
    y = jnp.dot(h.astype(wo_ref.dtype), wo_ref[...],
                preferred_element_type=jnp.float32)
    o_ref[...] = (y + bo_ref[...]).astype(o_ref.dtype)


# ---------------------------------------------------------------------------
# One-time parameter preparation: pad hidden dims to lane multiples, cast
# matmul operands to the requested dtype, keep biases f32. Input dim D and
# output dim O stay unpadded (full-dim blocks are legal; zero-padded hidden
# columns propagate as tanh(0)=0 and contribute nothing downstream).
# ---------------------------------------------------------------------------
def prepare_params(params, operand_dtype=jnp.bfloat16):
    (w1, b1), (w2, b2), (wo, bo) = params
    D, H1 = w1.shape
    H2, O = w2.shape[1], wo.shape[1]
    H1p, H2p = _round_up(H1, LANE), _round_up(H2, LANE)

    pad2 = lambda a, r, c: jnp.pad(a, ((0, r - a.shape[0]), (0, c - a.shape[1])))

    w1p = pad2(w1, D, H1p).astype(operand_dtype)
    w2p = pad2(w2, H1p, H2p).astype(operand_dtype)
    wop = pad2(wo, H2p, O).astype(operand_dtype)
    b1p = pad2(b1, 1, H1p).astype(jnp.float32)
    b2p = pad2(b2, 1, H2p).astype(jnp.float32)
    bop = bo.astype(jnp.float32)  # (1, O), unpadded
    return (w1p, b1p, w2p, b2p, wop, bop)


# ---------------------------------------------------------------------------
# Jitted Pallas forward. tile_b and the real hidden sizes are static.
# ---------------------------------------------------------------------------
@functools.partial(jax.jit, static_argnames=("tile_b", "hidden_sizes"))
def _fnn_forward_pallas(x, prepared, *, tile_b, hidden_sizes):
    w1p, b1p, w2p, b2p, wop, bop = prepared
    B, D = x.shape
    O = wop.shape[1]
    H1, H2 = hidden_sizes

    TB = tile_b
    Bp = _round_up(max(B, TB), TB)
    xp = jnp.pad(x, ((0, Bp - B), (0, 0))) if Bp != B else x
    grid = (Bp // TB,)

    # Weights/biases: constant block index -> VMEM-resident across all tiles.
    resident = lambda a: pl.BlockSpec(a.shape, lambda i: (0,) * a.ndim)

    # Cost estimate from real (unpadded) dims / actually-DMA'd bytes.
    itemsize = lambda a: a.size * a.dtype.itemsize
    flops = 2 * B * (D * H1 + H1 * H2 + H2 * O)
    transcendentals = B * (H1 + H2)
    bytes_accessed = (itemsize(xp) + itemsize(w1p) + itemsize(b1p)
                      + itemsize(w2p) + itemsize(b2p) + itemsize(wop)
                      + itemsize(bop) + Bp * O * 4)

    out = pl.pallas_call(
        fnn_kernel,
        out_shape=jax.ShapeDtypeStruct((Bp, O), jnp.float32),
        grid=grid,
        in_specs=[
            # streamed activations, unpadded feature dim (block dim == full dim)
            pl.BlockSpec((TB, D), lambda i: (i, 0)),
            resident(w1p), resident(b1p),
            resident(w2p), resident(b2p),
            resident(wop), resident(bop),
        ],
        # true-width output (block last dim == full array dim); no padded slab
        out_specs=pl.BlockSpec((TB, O), lambda i: (i, 0)),
        compiler_params=pltpu.CompilerParams(
            dimension_semantics=("parallel",)),
        cost_estimate=pl.CostEstimate(flops=flops,
                                      transcendentals=transcendentals,
                                      bytes_accessed=bytes_accessed),
    )(xp, w1p, b1p, w2p, b2p, wop, bop)

    return out[:B] if Bp != B else out


def fnn_forward(x, params, *, prepared=None, tile_b=1024,
                operand_dtype=jnp.bfloat16, min_pallas_batch=256):
    """FNN forward.

    x: [B, input_size] f32 (fold rollout/env loops into B for the Pallas path).
    params: list of (W [in, out], b [1, out]) per layer (f32).
    prepared: optional output of prepare_params(params, operand_dtype) — pass
              it to avoid re-padding/re-casting weights every call.
    min_pallas_batch: below this batch size, use the plain-JAX path (a single
              padded tile is pure launch/pad overhead for this network size).
    """
    B = x.shape[0]
    if B < min_pallas_batch:
        return fnn_reference(x, params)
    if prepared is None:
        prepared = prepare_params(params, operand_dtype)
    H1, H2 = params[0][0].shape[1], params[1][0].shape[1]
    return _fnn_forward_pallas(x, prepared, tile_b=tile_b,
                               hidden_sizes=(H1, H2))


# ---------------------------------------------------------------------------
# Deterministic parameter construction (mimics nn.Linear default uniform init
# with bound 1/sqrt(fan_in); purely synthetic, no checkpoint loading).
# ---------------------------------------------------------------------------
def make_params(key, input_size, hidden_sizes, output_size):
    sizes = [input_size] + list(hidden_sizes) + [output_size]
    params = []
    for i in range(len(sizes) - 1):
        fan_in, fan_out = sizes[i], sizes[i + 1]
        key, kw, kb = jax.random.split(key, 3)
        bound = 1.0 / jnp.sqrt(fan_in)
        # Stored already transposed: [in, out]  (PyTorch stores [out, in])
        w = jax.random.uniform(kw, (fan_in, fan_out), jnp.float32, -bound, bound)
        b = jax.random.uniform(kb, (1, fan_out), jnp.float32, -bound, bound)
        params.append((w, b))
    return params


def fnn_reference(x, params):
    """Plain-JAX reference of the same forward pass."""
    (w1, b1), (w2, b2), (wo, bo) = params
    h = jnp.tanh(x @ w1 + b1)
    h = jnp.tanh(h @ w2 + b2)
    return h @ wo + bo


if __name__ == "__main__":
    # Module config: FNN(input_size=16, output_size=8, hidden_sizes=(32, 32),
    #                    hidden_nonlin=torch.tanh, dropout=0.0, output_nonlin=None)
    batch, input_size, hidden_sizes, output_size = 2, 16, (32, 32), 8

    key = jax.random.PRNGKey(0)
    key, kx_small, kx_big = jax.random.split(key, 3)
    params = make_params(key, input_size, hidden_sizes, output_size)

    # 1) Small batch (module-consistent shapes) forced through the Pallas
    #    kernel with f32 operands: tight correctness check of the kernel body.
    x_small = jax.random.normal(kx_small, (batch, input_size), jnp.float32)
    prep_f32 = prepare_params(params, operand_dtype=jnp.float32)
    out_small = jax.block_until_ready(
        fnn_forward(x_small, params, prepared=prep_f32, tile_b=256,
                    min_pallas_batch=0))
    ref_small = fnn_reference(x_small, params)
    assert out_small.shape == (batch, output_size)
    assert jnp.allclose(out_small, ref_small, atol=1e-5, rtol=1e-5), \
        "small-batch Pallas mismatch vs reference"

    # 2) Folded rollout batch (the intended performance path): grid of 4 tiles
    #    (>=2 so both v7x TensorCores are used), bf16 matmul operands, weights
    #    pre-padded once and VMEM-resident, activations streamed unpadded.
    big_batch, tile_b = 4096, 1024
    x_big = jax.random.normal(kx_big, (big_batch, input_size), jnp.float32)
    prep_bf16 = prepare_params(params, operand_dtype=jnp.bfloat16)
    out_big = jax.block_until_ready(
        fnn_forward(x_big, params, prepared=prep_bf16, tile_b=tile_b))
    ref_big = fnn_reference(x_big, params)
    assert out_big.shape == (big_batch, output_size)
    assert jnp.allclose(out_big, ref_big, atol=5e-2, rtol=5e-2), \
        "batched bf16-operand mismatch vs reference"

    # 3) Tiny-batch auto-dispatch: falls back to the plain-JAX path (a Pallas
    #    launch is pure overhead at this size) and matches the reference.
    out_tiny = jax.block_until_ready(fnn_forward(x_small, params))
    assert jnp.allclose(out_tiny, ref_small, atol=1e-6, rtol=1e-6), \
        "tiny-batch fallback mismatch vs reference"

    print("KERNEL_OK")
</pallas_src>

<mosaic_0001>
module attributes {stable_mosaic.version = 11 : i64} {
  func.func @fnn_kernel(%arg0: i32, %arg1: memref<256x16xf32, #tpu.memory_space<vmem>>, %arg2: memref<16x128xf32, #tpu.memory_space<vmem>>, %arg3: memref<1x128xf32, #tpu.memory_space<vmem>>, %arg4: memref<128x128xf32, #tpu.memory_space<vmem>>, %arg5: memref<1x128xf32, #tpu.memory_space<vmem>>, %arg6: memref<128x8xf32, #tpu.memory_space<vmem>>, %arg7: memref<1x8xf32, #tpu.memory_space<vmem>>, %arg8: memref<256x8xf32, #tpu.memory_space<vmem>>) attributes {dimension_semantics = [#tpu.dimension_semantics<parallel>], iteration_bounds = array<i64: 1>, scalar_prefetch = 0 : i64, scratch_operands = 0 : i64, tpu.core_type = #tpu.core_type<tc>, window_params = [{transform_indices = @transform_0, window_bounds = array<i64: 256, 16>}, {pipeline_mode = #tpu.pipeline_mode<synchronous>, transform_indices = @transform_1, window_bounds = array<i64: 16, 128>}, {pipeline_mode = #tpu.pipeline_mode<synchronous>, transform_indices = @transform_2, window_bounds = array<i64: 1, 128>}, {pipeline_mode = #tpu.pipeline_mode<synchronous>, transform_indices = @transform_3, window_bounds = array<i64: 128, 128>}, {pipeline_mode = #tpu.pipeline_mode<synchronous>, transform_indices = @transform_4, window_bounds = array<i64: 1, 128>}, {pipeline_mode = #tpu.pipeline_mode<synchronous>, transform_indices = @transform_5, window_bounds = array<i64: 128, 8>}, {pipeline_mode = #tpu.pipeline_mode<synchronous>, transform_indices = @transform_6, window_bounds = array<i64: 1, 8>}, {transform_indices = @transform_7, window_bounds = array<i64: 256, 8>}]} {
    %c0 = arith.constant 0 : index
    %c0_0 = arith.constant 0 : index
    %0 = vector.load %arg1[%c0, %c0_0] : memref<256x16xf32, #tpu.memory_space<vmem>>, vector<256x16xf32>
    %c0_1 = arith.constant 0 : index
    %c0_2 = arith.constant 0 : index
    %1 = vector.load %arg2[%c0_1, %c0_2] : memref<16x128xf32, #tpu.memory_space<vmem>>, vector<16x128xf32>
    %cst = arith.constant dense<0.000000e+00> : vector<256x128xf32>
    %2 = tpu.matmul %0, %1, %cst {dimension_numbers = #tpu.dot_dimension_numbers<[1], [0], [0], [1], [0, 0, 1, 1], [], []>} : vector<256x16xf32>, vector<16x128xf32>, vector<256x128xf32> -> vector<256x128xf32>
    %c0_3 = arith.constant 0 : index
    %c0_4 = arith.constant 0 : index
    %3 = vector.load %arg3[%c0_3, %c0_4] : memref<1x128xf32, #tpu.memory_space<vmem>>, vector<1x128xf32>
    %4 = vector.broadcast %3 : vector<1x128xf32> to vector<256x128xf32>
    %5 = arith.addf %2, %4 : vector<256x128xf32>
    %6 = math.tanh %5 : vector<256x128xf32>
    %c0_5 = arith.constant 0 : index
    %c0_6 = arith.constant 0 : index
    %7 = vector.load %arg4[%c0_5, %c0_6] : memref<128x128xf32, #tpu.memory_space<vmem>>, vector<128x128xf32>
    %cst_7 = arith.constant dense<0.000000e+00> : vector<256x128xf32>
    %8 = tpu.matmul %6, %7, %cst_7 {dimension_numbers = #tpu.dot_dimension_numbers<[1], [0], [0], [1], [0, 0, 1, 1], [], []>} : vector<256x128xf32>, vector<128x128xf32>, vector<256x128xf32> -> vector<256x128xf32>
    %c0_8 = arith.constant 0 : index
    %c0_9 = arith.constant 0 : index
    %9 = vector.load %arg5[%c0_8, %c0_9] : memref<1x128xf32, #tpu.memory_space<vmem>>, vector<1x128xf32>
    %10 = vector.broadcast %9 : vector<1x128xf32> to vector<256x128xf32>
    %11 = arith.addf %8, %10 : vector<256x128xf32>
    %12 = math.tanh %11 : vector<256x128xf32>
    %c0_10 = arith.constant 0 : index
    %c0_11 = arith.constant 0 : index
    %13 = vector.load %arg6[%c0_10, %c0_11] : memref<128x8xf32, #tpu.memory_space<vmem>>, vector<128x8xf32>
    %cst_12 = arith.constant dense<0.000000e+00> : vector<256x8xf32>
    %14 = tpu.matmul %12, %13, %cst_12 {dimension_numbers = #tpu.dot_dimension_numbers<[1], [0], [0], [1], [0, 0, 1, 1], [], []>} : vector<256x128xf32>, vector<128x8xf32>, vector<256x8xf32> -> vector<256x8xf32>
    %c0_13 = arith.constant 0 : index
    %c0_14 = arith.constant 0 : index
    %15 = vector.load %arg7[%c0_13, %c0_14] : memref<1x8xf32, #tpu.memory_space<vmem>>, vector<1x8xf32>
    %16 = vector.broadcast %15 : vector<1x8xf32> to vector<256x8xf32>
    %17 = arith.addf %14, %16 : vector<256x8xf32>
    %c0_15 = arith.constant 0 : index
    %c0_16 = arith.constant 0 : index
    %18 = vector.load %arg8[%c0_15, %c0_16] : memref<256x8xf32, #tpu.memory_space<vmem>>, vector<256x8xf32>
    tpu.vector_store %arg8[%c0_15, %c0_16], %17 {strides = array<i32>} : memref<256x8xf32, #tpu.memory_space<vmem>>, vector<256x8xf32>,
    return
  }
  func.func @transform_0(%arg0: i32) -> (i32, i32) {
    %c0_i32 = arith.constant 0 : i32
    %c0_i32_0 = arith.constant 0 : i32
    return %arg0, %c0_i32 : i32, i32
  }
  func.func @transform_1(%arg0: i32) -> (i32, i32) {
    %c0_i32 = arith.constant 0 : i32
    %c0_i32_0 = arith.constant 0 : i32
    %c0_i32_1 = arith.constant 0 : i32
    return %c0_i32, %c0_i32_0 : i32, i32
  }
  func.func @transform_2(%arg0: i32) -> (i32, i32) {
    %c0_i32 = arith.constant 0 : i32
    %c0_i32_0 = arith.constant 0 : i32
    %c0_i32_1 = arith.constant 0 : i32
    return %c0_i32, %c0_i32_0 : i32, i32
  }
  func.func @transform_3(%arg0: i32) -> (i32, i32) {
    %c0_i32 = arith.constant 0 : i32
    %c0_i32_0 = arith.constant 0 : i32
    %c0_i32_1 = arith.constant 0 : i32
    return %c0_i32, %c0_i32_0 : i32, i32
  }
  func.func @transform_4(%arg0: i32) -> (i32, i32) {
    %c0_i32 = arith.constant 0 : i32
    %c0_i32_0 = arith.constant 0 : i32
    %c0_i32_1 = arith.constant 0 : i32
    return %c0_i32, %c0_i32_0 : i32, i32
  }
  func.func @transform_5(%arg0: i32) -> (i32, i32) {
    %c0_i32 = arith.constant 0 : i32
    %c0_i32_0 = arith.constant 0 : i32
    %c0_i32_1 = arith.constant 0 : i32
    return %c0_i32, %c0_i32_0 : i32, i32
  }
  func.func @transform_6(%arg0: i32) -> (i32, i32) {
    %c0_i32 = arith.constant 0 : i32
    %c0_i32_0 = arith.constant 0 : i32
    %c0_i32_1 = arith.constant 0 : i32
    return %c0_i32, %c0_i32_0 : i32, i32
  }
  func.func @transform_7(%arg0: i32) -> (i32, i32) {
    %c0_i32 = arith.constant 0 : i32
    %c0_i32_0 = arith.constant 0 : i32
    return %arg0, %c0_i32 : i32, i32
  }
}

</mosaic_0001>

<bundles_post_ra>
// kernel: _fnn_forward_pallas.1
= control target key start
LH: loop header
LB: loop body
LE: loop exit
PB: predicated region body
PF: predicated region fallthrough
CT: control target
= control target key end

     0   :  { %vm67_vm0 = vcmask 130048   ;;  %vm949_vm1 = vcmask 64512   ;;  %s2112_s1 = inlined_call_operand.vmem [shape: f32[16,128], index: 1, kind: input, shape index: {}]   ;;  %s2113_s0 = inlined_call_operand.vmem [shape: f32[256,16], index: 0, kind: input, shape index: {}]   ;;  %s2114_s3 = inlined_call_operand.vmem [shape: f32[128,128], index: 3, kind: input, shape index: {}]   ;;  %s2115_s5 = inlined_call_operand.vmem [shape: f32[128,8], index: 5, kind: input, shape index: {}]   ;;  %s2116_s2 = inlined_call_operand.vmem [shape: f32[1,128], index: 2, kind: input, shape index: {}]   ;;  %s2117_s4 = inlined_call_operand.vmem [shape: f32[1,128], index: 4, kind: input, shape index: {}]   ;;  %s2118_s6 = inlined_call_operand.vmem [shape: f32[1,8], index: 6, kind: input, shape index: {}]   ;;  %s2119_s7 = inlined_call_operand.vmem [shape: f32[256,8], index: 7, kind: output, shape index: {}]  }
   0x1   :  { %v58_v0 = vld [vmem:[%s2112_s1] sm:$0xff]  ;;  %v59_v1 = vld [vmem:[%s2112_s1 + $0x8] sm:$0xff]  ;;  %v28_v5 = vld [vmem:[%s2113_s0 + $0x10] sm:$0xff] }
   0x2   :  { %v26_v2 = vld [vmem:[%s2113_s0] sm:$0xff]  ;;  %v1363_v3 = vpack.c.bf16 %v59_v1, %v58_v0  ;;  %v27_v4 = vld [vmem:[%s2113_s0 + $0x8] sm:$0xff]  ;;  %v44_v8 = vld [vmem:[%s2113_s0 + $0x90] sm:$0xff] }
   0x3   :  { %1155 = vmatprep.mubr.msk.f32.mxu0 %vm67_vm0, %v26_v2  ;;  %v42_v6 = vld [vmem:[%s2113_s0 + $0x80] sm:$0xff]  ;;  %v43_v7 = vld [vmem:[%s2113_s0 + $0x88] sm:$0xff]  ;;  %v29_v9 = vld [vmem:[%s2113_s0 + $0x18] sm:$0xff] }
   0x4   :  { %1364 = vmatprep.subr.bf16.mxu0 %v1363_v3  ;;  %1431 = vmatprep.subr.bf16.mxu1 %v1363_v3  ;;  %v30_v10 = vld [vmem:[%s2113_s0 + $0x20] sm:$0xff]  ;;  %v45_v11 = vld [vmem:[%s2113_s0 + $0x98] sm:$0xff]  ;;  %v422_v14 = vld [vmem:[%s2114_s3 + $0x8] sm:$0xff] }
   0x5   :  { %1366 = vmatpush3.bf16.msra.mxu0 %v1363_v3  ;;  %1432 = vmatpush3.bf16.msra.mxu1 %v1363_v3  ;;  %v46_v12 = vld [vmem:[%s2113_s0 + $0xa0] sm:$0xff]  ;;  %v31_v15 = vld [vmem:[%s2113_s0 + $0x28] sm:$0xff]  ;;  %v423_v17 = vld [vmem:[%s2114_s3 + $0x10] sm:$0xff] }
   0x6   :  { %1179 = vmatprep.mubr.msk.f32.mxu1 %vm67_vm0, %v42_v6  ;;  %v421_v13 = vld [vmem:[%s2114_s3] sm:$0xff]  ;;  %v424_v18 = vld [vmem:[%s2114_s3 + $0x18] sm:$0xff]  ;;  %v32_v19 = vld [vmem:[%s2113_s0 + $0x30] sm:$0xff] }
   0x7   :  { %v1367_v16 = vpack.c.bf16 %v422_v14, %v421_v13  ;;  %v47_v20 = vld [vmem:[%s2113_s0 + $0xa8] sm:$0xff]  ;;  %v1371_v21 = vpack.c.bf16 %v424_v18, %v423_v17  ;;  %v48_v22 = vld [vmem:[%s2113_s0 + $0xb0] sm:$0xff]  ;;  %v425_v23 = vld [vmem:[%s2114_s3 + $0x20] sm:$0xff] }
   0x8   :  { %1156 = vmatmul.mubr.msk.f32.vlgmr.msra.gmra.mrb[0].mxu0 %vm67_vm0, %v27_v4  ;;  %1180 = vmatmul.mubr.msk.f32.vlgmr.msra.gmra.mrb[0].mxu1 %vm67_vm0, %v43_v7  ;;  %v426_v24 = vld [vmem:[%s2114_s3 + $0x28] sm:$0xff]  ;;  %v33_v25 = vld [vmem:[%s2113_s0 + $0x38] sm:$0xff]  ;;  %v34_v26 = vld [vmem:[%s2113_s0 + $0x40] sm:$0xff] }
   0x9   :  { %1158 = vmatprep.mubr.msk.f32.mxu0 %vm67_vm0, %v28_v5  ;;  %1182 = vmatprep.mubr.msk.f32.mxu1 %vm67_vm0, %v44_v8  ;;  %v49_v27 = vld [vmem:[%s2113_s0 + $0xb8] sm:$0xff]  ;;  %v1375_v28 = vpack.c.bf16 %v426_v24, %v425_v23  ;;  %v50_v29 = vld [vmem:[%s2113_s0 + $0xc0] sm:$0xff]  ;;  %v427_v30 = vld [vmem:[%s2114_s3 + $0x30] sm:$0xff] }
   0xa   :  { %1368 = vmatprep.subr.bf16.mxu1 %v1367_v16  ;;  %v428_v31 = vld [vmem:[%s2114_s3 + $0x38] sm:$0xff]  ;;  %v35_v32 = vld [vmem:[%s2113_s0 + $0x48] sm:$0xff]  ;;  %v36_v33 = vld [vmem:[%s2113_s0 + $0x50] sm:$0xff] }
   0xb   :  { %1370 = vmatpush3.bf16.msra.mxu1 %v1367_v16  ;;  %v51_v34 = vld [vmem:[%s2113_s0 + $0xc8] sm:$0xff]  ;;  %v1379_v35 = vpack.c.bf16 %v428_v31, %v427_v30  ;;  %v52_v36 = vld [vmem:[%s2113_s0 + $0xd0] sm:$0xff]  ;;  %v429_v37 = vld [vmem:[%s2114_s3 + $0x40] sm:$0xff] }
   0xc   :  { %1159 = vmatmul.mubr.msk.f32.gmra.mrb[2].mxu0 %vm67_vm0, %v29_v9  ;;  %1183 = vmatmul.mubr.msk.f32.gmra.mrb[2].mxu1 %vm67_vm0, %v45_v11  ;;  %v430_v38 = vld [vmem:[%s2114_s3 + $0x48] sm:$0xff]  ;;  %v37_v39 = vld [vmem:[%s2113_s0 + $0x58] sm:$0xff]  ;;  %v38_v40 = vld [vmem:[%s2113_s0 + $0x60] sm:$0xff] }
   0xd   :  { %1161 = vmatprep.mubr.msk.f32.mxu0 %vm67_vm0, %v30_v10  ;;  %1185 = vmatprep.mubr.msk.f32.mxu1 %vm67_vm0, %v46_v12  ;;  %v53_v41 = vld [vmem:[%s2113_s0 + $0xd8] sm:$0xff]  ;;  %v1383_v42 = vpack.c.bf16 %v430_v38, %v429_v37  ;;  %v54_v43 = vld [vmem:[%s2113_s0 + $0xe0] sm:$0xff]  ;;  %v39_v44 = vld [vmem:[%s2113_s0 + $0x68] sm:$0xff] }
   0xe   :  { %1372 = vmatprep.subr.bf16.mxu1 %v1371_v21  ;;  %v40_v45 = vld [vmem:[%s2113_s0 + $0x70] sm:$0xff]  ;;  %v55_v46 = vld [vmem:[%s2113_s0 + $0xe8] sm:$0xff]  ;;  %v41_v48 = vld [vmem:[%s2113_s0 + $0x78] sm:$0xff] }
   0xf   :  { %1374 = vmatpush3.bf16.msra.mxu1 %v1371_v21  ;;  %v56_v47 = vld [vmem:[%s2113_s0 + $0xf0] sm:$0xff]  ;;  %v57_v49 = vld [vmem:[%s2113_s0 + $0xf8] sm:$0xff]  ;;  %v433_v53 = vld [vmem:[%s2114_s3 + $0x60] sm:$0xff] }
  0x10   :  { %1162 = vmatmul.mubr.msk.f32.gmra.mrb[4].mxu0 %vm67_vm0, %v31_v15  ;;  %1186 = vmatmul.mubr.msk.f32.gmra.mrb[4].mxu1 %vm67_vm0, %v47_v20  ;;  %v431_v50 = vld [vmem:[%s2114_s3 + $0x50] sm:$0xff]  ;;  %v432_v51 = vld [vmem:[%s2114_s3 + $0x58] sm:$0xff]  ;;  %v434_v54 = vld [vmem:[%s2114_s3 + $0x68] sm:$0xff] }
  0x11   :  { %1164 = vmatprep.mubr.msk.f32.mxu0 %vm67_vm0, %v32_v19  ;;  %1188 = vmatprep.mubr.msk.f32.mxu1 %vm67_vm0, %v48_v22  ;;  %v1387_v52 = vpack.c.bf16 %v432_v51, %v431_v50  ;;  %v1391_v55 = vpack.c.bf16 %v434_v54, %v433_v53  ;;  %v435_v56 = vld [vmem:[%s2114_s3 + $0x70] sm:$0xff]  ;;  %v436_v57 = vld [vmem:[%s2114_s3 + $0x78] sm:$0xff]  ;;  %v701_v59 = vld [vmem:[%s2115_s5] sm:$0xff] }
  0x12   :  { %1376 = vmatprep.subr.bf16.mxu1 %v1375_v28  ;;  %v1395_v58 = vpack.c.bf16 %v436_v57, %v435_v56  ;;  %v702_v60 = vld [vmem:[%s2115_s5 + $0x8] sm:$0xff]  ;;  %v703_v61 = vld [vmem:[%s2115_s5 + $0x10] sm:$0xff]  ;;  %v704_v63 = vld [vmem:[%s2115_s5 + $0x18] sm:$0xff] }
  0x13   :  { %1378 = vmatpush3.bf16.msra.mxu1 %v1375_v28  ;;  %v1399_v62 = vpack.c.bf16 %v702_v60, %v701_v59  ;;  %v1403_v0 = vpack.c.bf16 %v704_v63, %v703_v61  ;;  %v705_v1 = vld [vmem:[%s2115_s5 + $0x20] sm:$0xff]  ;;  %v706_v2 = vld [vmem:[%s2115_s5 + $0x28] sm:$0xff]  ;;  %v707_v4 = vld [vmem:[%s2115_s5 + $0x30] sm:$0xff] }
  0x14   :  { %1165 = vmatmul.mubr.msk.f32.gmra.mrb[6].mxu0 %vm67_vm0, %v33_v25  ;;  %1189 = vmatmul.mubr.msk.f32.gmra.mrb[6].mxu1 %vm67_vm0, %v49_v27  ;;  %v1407_v3 = vpack.c.bf16 %v706_v2, %v705_v1  ;;  %v708_v5 = vld [vmem:[%s2115_s5 + $0x38] sm:$0xff]  ;;  %v709_v7 = vld [vmem:[%s2115_s5 + $0x40] sm:$0xff]  ;;  %v710_v8 = vld [vmem:[%s2115_s5 + $0x48] sm:$0xff] }
  0x15   :  { %1167 = vmatprep.mubr.msk.f32.mxu0 %vm67_vm0, %v34_v26  ;;  %1191 = vmatprep.mubr.msk.f32.mxu1 %vm67_vm0, %v50_v29  ;;  %v1411_v6 = vpack.c.bf16 %v708_v5, %v707_v4  ;;  %v1415_v9 = vpack.c.bf16 %v710_v8, %v709_v7  ;;  %v1816_v10 = vld [vmem:[%s2116_s2] ss:$0 sm:$0xff] }
  0x16   :  { %1380 = vmatprep.subr.bf16.mxu1 %v1379_v35  ;;  %1400 = vmatprep.subr.bf16.mxu0 %v1399_v62 }
  0x17   :  { %1382 = vmatpush3.bf16.msra.mxu1 %v1379_v35  ;;  %1402 = vmatpush3.bf16.msra.mxu0 %v1399_v62 }
  0x18   :  { %1168 = vmatmul.mubr.msk.f32.gmra.mrb[8].mxu0 %vm67_vm0, %v35_v32  ;;  %1192 = vmatmul.mubr.msk.f32.gmra.mrb[8].mxu1 %vm67_vm0, %v51_v34 }
  0x19   :  { %1170 = vmatprep.mubr.msk.f32.mxu0 %vm67_vm0, %v36_v33  ;;  %1194 = vmatprep.mubr.msk.f32.mxu1 %vm67_vm0, %v52_v36 }
  0x1a   :  { %1384 = vmatprep.subr.bf16.mxu1 %v1383_v42  ;;  %1404 = vmatprep.subr.bf16.mxu0 %v1403_v0 }
  0x1b   :  { %1386 = vmatpush3.bf16.msra.mxu1 %v1383_v42  ;;  %1406 = vmatpush3.bf16.msra.mxu0 %v1403_v0 }
  0x1c   :  { %1171 = vmatmul.mubr.msk.f32.gmra.mrb[10].mxu0 %vm67_vm0, %v37_v39  ;;  %1195 = vmatmul.mubr.msk.f32.gmra.mrb[10].mxu1 %vm67_vm0, %v53_v41 }
  0x1d   :  { %1173 = vmatprep.mubr.msk.f32.mxu0 %vm67_vm0, %v38_v40  ;;  %1197 = vmatprep.mubr.msk.f32.mxu1 %vm67_vm0, %v54_v43 }
  0x1e   :  { %1388 = vmatprep.subr.bf16.mxu1 %v1387_v52  ;;  %1408 = vmatprep.subr.bf16.mxu0 %v1407_v3 }
  0x1f   :  { %1390 = vmatpush3.bf16.msra.mxu1 %v1387_v52  ;;  %1410 = vmatpush3.bf16.msra.mxu0 %v1407_v3 }
  0x20   :  { %1174 = vmatmul.mubr.msk.f32.gmra.mrb[12].mxu0 %vm67_vm0, %v39_v44  ;;  %1198 = vmatmul.mubr.msk.f32.gmra.mrb[12].mxu1 %vm67_vm0, %v55_v46 }
  0x21   :  { %1176 = vmatprep.mubr.msk.f32.mxu0 %vm67_vm0, %v40_v45  ;;  %1200 = vmatprep.mubr.msk.f32.mxu1 %vm67_vm0, %v56_v47 }
  0x22   :  { %1392 = vmatprep.subr.bf16.mxu1 %v1391_v55  ;;  %1412 = vmatprep.subr.bf16.mxu0 %v1411_v6 }
  0x23   :  { %1394 = vmatpush3.bf16.msra.mxu1 %v1391_v55  ;;  %1414 = vmatpush3.bf16.msra.mxu0 %v1411_v6 }
  0x24   :  { %1177 = vmatmul.mubr.msk.f32.gmra.mrb[14].mxu0 %vm67_vm0, %v41_v48  ;;  %1201 = vmatmul.mubr.msk.f32.gmra.mrb[14].mxu1 %vm67_vm0, %v57_v49 }
  0x25   :  { %1396 = vmatprep.subr.bf16.mxu1 %v1395_v58  ;;  %1416 = vmatprep.subr.bf16.mxu0 %v1415_v9 }
  0x27   :  { %1398 = vmatpush3.bf16.msra.mxu1 %v1395_v58  ;;  %1418 = vmatpush3.bf16.msra.mxu0 %v1415_v9 }
  0xdb   :  { %v1157_v11 = vpop.f32.mrb[0].mxu0  ;;  %v1819_v14 = vpop.f32.mrb[0].mxu1 }
  0xdc   :  { %v236_v12 = vadd.f32 %v1157_v11, %v1816_v10  ;;  %v230_v13 = vpop.f32.mrb[1].mxu0  ;;  %v1822_v16 = vpop.f32.mrb[1].mxu1  ;;  %v316_v7 = vadd.f32 %v1819_v14, %v1816_v10 }
  0xdd   :  { %v231_v15 = vadd.f32 %v1816_v10, %v230_v13  ;;  %v311_v61 = vadd.f32 %v1816_v10, %v1822_v16 }
  0xdf   :  { %1433 = vtanh.f32 %v231_v15  ;;  %v1160_v17 = vpop.f32.mrb[2].mxu0  ;;  %v1825_v20 = vpop.f32.mrb[2].mxu1 }
  0xe0   :  { %1435 = vtanh.f32 %v236_v12  ;;  %v246_v18 = vadd.f32 %v1160_v17, %v1816_v10  ;;  %v240_v19 = vpop.f32.mrb[3].mxu0  ;;  %v1828_v22 = vpop.f32.mrb[3].mxu1  ;;  %v326_v12 = vadd.f32 %v1825_v20, %v1816_v10 }
  0xe1   :  { %v241_v21 = vadd.f32 %v1816_v10, %v240_v19  ;;  %v321_v6 = vadd.f32 %v1816_v10, %v1828_v22 }
  0xe3   :  { %1437 = vtanh.f32 %v241_v21  ;;  %v1163_v23 = vpop.f32.mrb[4].mxu0  ;;  %v1831_v26 = vpop.f32.mrb[4].mxu1 }
  0xe4   :  { %1439 = vtanh.f32 %v246_v18  ;;  %v256_v24 = vadd.f32 %v1163_v23, %v1816_v10  ;;  %v250_v25 = vpop.f32.mrb[5].mxu0  ;;  %v1834_v28 = vpop.f32.mrb[5].mxu1  ;;  %v336_v17 = vadd.f32 %v1831_v26, %v1816_v10 }
  0xe5   :  { %v251_v27 = vadd.f32 %v1816_v10, %v250_v25  ;;  %v331_v11 = vadd.f32 %v1816_v10, %v1834_v28 }
  0xe7   :  { %1441 = vtanh.f32 %v251_v27  ;;  %v1166_v29 = vpop.f32.mrb[6].mxu0  ;;  %v1837_v32 = vpop.f32.mrb[6].mxu1 }
  0xe8   :  { %1443 = vtanh.f32 %v256_v24  ;;  %v266_v30 = vadd.f32 %v1166_v29, %v1816_v10  ;;  %v260_v31 = vpop.f32.mrb[7].mxu0  ;;  %v1840_v35 = vpop.f32.mrb[7].mxu1  ;;  %v346_v21 = vadd.f32 %v1837_v32, %v1816_v10 }
  0xe9   :  { %v1434_v33 = vpop.eup %1433  ;;  %v261_v34 = vadd.f32 %v1816_v10, %v260_v31  ;;  %v341_v14 = vadd.f32 %v1816_v10, %v1840_v35 }
  0xea   :  { %v1436_v36 = vpop.eup %1435  ;;  %1235 = vmatprep.mubr.f32.mxu1 %v1434_v33 }
  0xeb   :  { %1445 = vtanh.f32 %v261_v34  ;;  %v1169_v37 = vpop.f32.mrb[8].mxu0  ;;  %1236 = vmatmul.mubr.f32.vlgmr.msra.gmra.mrb[16].mxu1 %v1436_v36  ;;  %v1843_v40 = vpop.f32.mrb[8].mxu1 }
  0xec   :  { %1447 = vtanh.f32 %v266_v30  ;;  %v276_v38 = vadd.f32 %v1169_v37, %v1816_v10  ;;  %v270_v39 = vpop.f32.mrb[9].mxu0  ;;  %v1846_v43 = vpop.f32.mrb[9].mxu1  ;;  %v356_v25 = vadd.f32 %v1843_v40, %v1816_v10 }
  0xed   :  { %v1438_v41 = vpop.eup %1437  ;;  %v271_v42 = vadd.f32 %v1816_v10, %v270_v39  ;;  %v351_v20 = vadd.f32 %v1816_v10, %v1846_v43 }
  0xee   :  { %v1440_v44 = vpop.eup %1439  ;;  %1238 = vmatprep.mubr.f32.mxu1 %v1438_v41 }
  0xef   :  { %1449 = vtanh.f32 %v271_v42  ;;  %v1172_v45 = vpop.f32.mrb[10].mxu0  ;;  %1239 = vmatmul.mubr.f32.gmra.mrb[18].mxu1 %v1440_v44  ;;  %v1849_v48 = vpop.f32.mrb[10].mxu1  ;;  %v712_v44 = vld [vmem:[%s2115_s5 + $0x58] sm:$0xff] }
  0xf0   :  { %1451 = vtanh.f32 %v276_v38  ;;  %v286_v46 = vadd.f32 %v1172_v45, %v1816_v10  ;;  %v280_v47 = vpop.f32.mrb[11].mxu0  ;;  %v1852_v51 = vpop.f32.mrb[11].mxu1  ;;  %v366_v29 = vadd.f32 %v1849_v48, %v1816_v10 }
  0xf1   :  { %v1442_v49 = vpop.eup %1441  ;;  %v281_v50 = vadd.f32 %v1816_v10, %v280_v47  ;;  %v361_v24 = vadd.f32 %v1816_v10, %v1852_v51  ;;  %v714_v47 = vld [vmem:[%s2115_s5 + $0x68] sm:$0xff] }
  0xf2   :  { %v1444_v52 = vpop.eup %1443  ;;  %1241 = vmatprep.mubr.f32.mxu1 %v1442_v49  ;;  %v715_v49 = vld [vmem:[%s2115_s5 + $0x70] sm:$0xff] }
  0xf3   :  { %1453 = vtanh.f32 %v281_v50  ;;  %v1175_v53 = vpop.f32.mrb[12].mxu0  ;;  %1242 = vmatmul.mubr.f32.gmra.mrb[20].mxu1 %v1444_v52  ;;  %v1855_v56 = vpop.f32.mrb[12].mxu1  ;;  %v716_v50 = vld [vmem:[%s2115_s5 + $0x78] sm:$0xff]  ;;  %v1913_v52 = vld [vmem:[%s2117_s4] ss:$0 sm:$0xff] }
  0xf4   :  { %1455 = vtanh.f32 %v286_v46  ;;  %v296_v54 = vadd.f32 %v1175_v53, %v1816_v10  ;;  %v290_v55 = vpop.f32.mrb[13].mxu0  ;;  %v370_v59 = vpop.f32.mrb[13].mxu1  ;;  %v376_v33 = vadd.f32 %v1855_v56, %v1816_v10  ;;  %v713_v46 = vld [vmem:[%s2115_s5 + $0x60] sm:$0xff]  ;;  %v1427_v51 = vpack.c.bf16 %v716_v50, %v715_v49 }
  0xf5   :  { %v1446_v57 = vpop.eup %1445  ;;  %v291_v58 = vadd.f32 %v1816_v10, %v290_v55  ;;  %v371_v28 = vadd.f32 %v1816_v10, %v370_v59  ;;  %v1423_v48 = vpack.c.bf16 %v714_v47, %v713_v46 }
  0xf6   :  { %v1448_v60 = vpop.eup %1447  ;;  %1244 = vmatprep.mubr.f32.mxu1 %v1446_v57 }
  0xf7   :  { %1457 = vtanh.f32 %v291_v58  ;;  %v1178_v62 = vpop.f32.mrb[14].mxu0  ;;  %1245 = vmatmul.mubr.f32.gmra.mrb[22].mxu1 %v1448_v60  ;;  %v1861_v1 = vpop.f32.mrb[14].mxu1 }
  0xf8   :  { %1459 = vtanh.f32 %v296_v54  ;;  %v306_v63 = vadd.f32 %v1178_v62, %v1816_v10  ;;  %v300_v0 = vpop.f32.mrb[15].mxu0  ;;  %v380_v4 = vpop.f32.mrb[15].mxu1  ;;  %v386_v36 = vadd.f32 %v1861_v1, %v1816_v10 }
  0xf9   :  { %v1450_v2 = vpop.eup %1449  ;;  %v301_v3 = vadd.f32 %v1816_v10, %v300_v0  ;;  %1461 = vtanh.f32 %v311_v61  ;;  %v381_v32 = vadd.f32 %v1816_v10, %v380_v4  ;;  %v711_v10 = vld [vmem:[%s2115_s5 + $0x50] sm:$0xff] }
  0xfa   :  { %v1452_v5 = vpop.eup %1451  ;;  %1247 = vmatprep.mubr.f32.mxu1 %v1450_v2  ;;  %v1419_v45 = vpack.c.bf16 %v712_v44, %v711_v10 }
  0xfb   :  { %1463 = vtanh.f32 %v301_v3  ;;  %1248 = vmatmul.mubr.f32.gmra.mrb[24].mxu1 %v1452_v5 }
  0xfc   :  { %1465 = vtanh.f32 %v306_v63  ;;  %1420 = vmatprep.subr.bf16.mxu0 %v1419_v45 }
  0xfd   :  { %v1454_v8 = vpop.eup %1453  ;;  %1467 = vtanh.f32 %v321_v6  ;;  %1422 = vmatpush3.bf16.msra.mxu0 %v1419_v45 }
  0xfe   :  { %v1456_v9 = vpop.eup %1455  ;;  %1250 = vmatprep.mubr.f32.mxu1 %v1454_v8  ;;  %1469 = vtanh.f32 %v316_v7  ;;  %1424 = vmatprep.subr.bf16.mxu0 %v1423_v48 }
  0xff   :  { %1251 = vmatmul.mubr.f32.gmra.mrb[26].mxu1 %v1456_v9  ;;  %1471 = vtanh.f32 %v331_v11 }
 0x100   :  { %1473 = vtanh.f32 %v326_v12 }
 0x101   :  { %v1458_v13 = vpop.eup %1457  ;;  %1475 = vtanh.f32 %v341_v14  ;;  %1426 = vmatpush3.bf16.msra.mxu0 %v1423_v48 }
 0x102   :  { %v1460_v15 = vpop.eup %1459  ;;  %1253 = vmatprep.mubr.f32.mxu1 %v1458_v13  ;;  %1477 = vtanh.f32 %v336_v17  ;;  %1428 = vmatprep.subr.bf16.mxu0 %v1427_v51 }
 0x103   :  { %1254 = vmatmul.mubr.f32.gmra.mrb[28].mxu1 %v1460_v15  ;;  %v1462_v16 = vpop.eup %1461  ;;  %1479 = vtanh.f32 %v351_v20 }
 0x104   :  { %1481 = vtanh.f32 %v346_v21 }
 0x105   :  { %v1464_v18 = vpop.eup %1463  ;;  %1483 = vtanh.f32 %v361_v24  ;;  %1430 = vmatpush3.bf16.msra.mxu0 %v1427_v51 }
 0x106   :  { %v1466_v19 = vpop.eup %1465  ;;  %1256 = vmatprep.mubr.f32.mxu1 %v1464_v18  ;;  %1485 = vtanh.f32 %v356_v25 }
 0x107   :  { %1257 = vmatmul.mubr.f32.gmra.mrb[30].mxu1 %v1466_v19  ;;  %v1468_v22 = vpop.eup %1467  ;;  %1487 = vtanh.f32 %v371_v28 }
 0x108   :  { %1259 = vmatprep.mubr.f32.mxu1 %v1462_v16  ;;  %v1470_v23 = vpop.eup %1469  ;;  %1489 = vtanh.f32 %v366_v29 }
 0x109   :  { %v1472_v26 = vpop.eup %1471  ;;  %1491 = vtanh.f32 %v381_v32 }
 0x10a   :  { %v1474_v27 = vpop.eup %1473  ;;  %1493 = vtanh.f32 %v376_v33 }
 0x10b   :  { %1260 = vmatmul.mubr.f32.gmra.mrb[32].mxu1 %v1470_v23  ;;  %v1476_v30 = vpop.eup %1475  ;;  %1495 = vtanh.f32 %v386_v36 }
 0x10c   :  { %1262 = vmatprep.mubr.f32.mxu1 %v1468_v22  ;;  %v1478_v31 = vpop.eup %1477 }
 0x10d   :  { %v1480_v34 = vpop.eup %1479 }
 0x10e   :  { %v1482_v35 = vpop.eup %1481 }
 0x10f   :  { %1263 = vmatmul.mubr.f32.gmra.mrb[34].mxu1 %v1474_v27  ;;  %v1484_v37 = vpop.eup %1483 }
 0x110   :  { %1265 = vmatprep.mubr.f32.mxu1 %v1472_v26  ;;  %v1486_v38 = vpop.eup %1485 }
 0x111   :  { %v1488_v39 = vpop.eup %1487 }
 0x112   :  { %v1490_v40 = vpop.eup %1489 }
 0x113   :  { %1266 = vmatmul.mubr.f32.gmra.mrb[36].mxu1 %v1478_v31  ;;  %v1492_v41 = vpop.eup %1491 }
 0x114   :  { %1268 = vmatprep.mubr.f32.mxu1 %v1476_v30  ;;  %v1494_v42 = vpop.eup %1493 }
 0x115   :  { %v1496_v43 = vpop.eup %1495 }
 0x117   :  { %1269 = vmatmul.mubr.f32.gmra.mrb[38].mxu1 %v1482_v35 }
 0x118   :  { %1271 = vmatprep.mubr.f32.mxu1 %v1480_v34 }
 0x11b   :  { %1272 = vmatmul.mubr.f32.gmra.mrb[40].mxu1 %v1486_v38 }
 0x11c   :  { %1274 = vmatprep.mubr.f32.mxu1 %v1484_v37 }
 0x11f   :  { %1275 = vmatmul.mubr.f32.gmra.mrb[42].mxu1 %v1490_v40 }
 0x120   :  { %1277 = vmatprep.mubr.f32.mxu1 %v1488_v39 }
 0x123   :  { %1278 = vmatmul.mubr.f32.gmra.mrb[44].mxu1 %v1494_v42 }
 0x124   :  { %1280 = vmatprep.mubr.f32.mxu1 %v1492_v41 }
 0x127   :  { %1281 = vmatmul.mubr.f32.gmra.mrb[46].mxu1 %v1496_v43 }
 0x1be   :  { %v1237_v53 = vpop.f32.mrb[16].mxu1 }
 0x1bf   :  { %v516_v54 = vadd.f32 %v1237_v53, %v1913_v52  ;;  %v510_v55 = vpop.f32.mrb[17].mxu1 }
 0x1c0   :  { %v511_v56 = vadd.f32 %v1913_v52, %v510_v55 }
 0x1c2   :  { %1497 = vtanh.f32 %v511_v56  ;;  %v1240_v57 = vpop.f32.mrb[18].mxu1 }
 0x1c3   :  { %1499 = vtanh.f32 %v516_v54  ;;  %v526_v58 = vadd.f32 %v1240_v57, %v1913_v52  ;;  %v520_v59 = vpop.f32.mrb[19].mxu1 }
 0x1c4   :  { %v521_v60 = vadd.f32 %v1913_v52, %v520_v59 }
 0x1c6   :  { %1501 = vtanh.f32 %v521_v60  ;;  %v1243_v61 = vpop.f32.mrb[20].mxu1 }
 0x1c7   :  { %1503 = vtanh.f32 %v526_v58  ;;  %v536_v62 = vadd.f32 %v1243_v61, %v1913_v52  ;;  %v530_v63 = vpop.f32.mrb[21].mxu1 }
 0x1c8   :  { %v531_v0 = vadd.f32 %v1913_v52, %v530_v63 }
 0x1ca   :  { %1505 = vtanh.f32 %v531_v0  ;;  %v1246_v1 = vpop.f32.mrb[22].mxu1 }
 0x1cb   :  { %1507 = vtanh.f32 %v536_v62  ;;  %v546_v2 = vadd.f32 %v1246_v1, %v1913_v52  ;;  %v540_v3 = vpop.f32.mrb[23].mxu1 }
 0x1cc   :  { %v1498_v4 = vpop.eup %1497  ;;  %v541_v5 = vadd.f32 %v1913_v52, %v540_v3 }
 0x1cd   :  { %v1500_v6 = vpop.eup %1499  ;;  %1315 = vmatprep.mubr.f32.mxu0 %v1498_v4 }
 0x1ce   :  { %1509 = vtanh.f32 %v541_v5  ;;  %v1249_v7 = vpop.f32.mrb[24].mxu1  ;;  %1316 = vmatmul.mubr.f32.vlgmr.msra.gmra.mrb[16].mxu0 %v1500_v6 }
 0x1cf   :  { %1511 = vtanh.f32 %v546_v2  ;;  %v556_v8 = vadd.f32 %v1249_v7, %v1913_v52  ;;  %v550_v9 = vpop.f32.mrb[25].mxu1 }
 0x1d0   :  { %v1502_v11 = vpop.eup %1501  ;;  %v551_v12 = vadd.f32 %v1913_v52, %v550_v9 }
 0x1d1   :  { %v1504_v13 = vpop.eup %1503  ;;  %1318 = vmatprep.mubr.f32.mxu0 %v1502_v11 }
 0x1d2   :  { %1513 = vtanh.f32 %v551_v12  ;;  %v1252_v15 = vpop.f32.mrb[26].mxu1  ;;  %1319 = vmatmul.mubr.f32.gmra.mrb[18].mxu0 %v1504_v13 }
 0x1d3   :  { %1515 = vtanh.f32 %v556_v8  ;;  %v566_v14 = vadd.f32 %v1252_v15, %v1913_v52  ;;  %v560_v16 = vpop.f32.mrb[27].mxu1 }
 0x1d4   :  { %v1506_v17 = vpop.eup %1505  ;;  %v561_v18 = vadd.f32 %v1913_v52, %v560_v16 }
 0x1d5   :  { %v1508_v19 = vpop.eup %1507  ;;  %1321 = vmatprep.mubr.f32.mxu0 %v1506_v17 }
 0x1d6   :  { %1517 = vtanh.f32 %v561_v18  ;;  %v1255_v20 = vpop.f32.mrb[28].mxu1  ;;  %1322 = vmatmul.mubr.f32.gmra.mrb[20].mxu0 %v1508_v19 }
 0x1d7   :  { %1519 = vtanh.f32 %v566_v14  ;;  %v576_v21 = vadd.f32 %v1255_v20, %v1913_v52  ;;  %v570_v22 = vpop.f32.mrb[29].mxu1 }
 0x1d8   :  { %v1510_v23 = vpop.eup %1509  ;;  %v571_v24 = vadd.f32 %v1913_v52, %v570_v22 }
 0x1d9   :  { %v1512_v25 = vpop.eup %1511  ;;  %1324 = vmatprep.mubr.f32.mxu0 %v1510_v23 }
 0x1da   :  { %1521 = vtanh.f32 %v571_v24  ;;  %v1258_v26 = vpop.f32.mrb[30].mxu1  ;;  %1325 = vmatmul.mubr.f32.gmra.mrb[22].mxu0 %v1512_v25 }
 0x1db   :  { %1523 = vtanh.f32 %v576_v21  ;;  %v586_v27 = vadd.f32 %v1258_v26, %v1913_v52  ;;  %v580_v28 = vpop.f32.mrb[31].mxu1 }
 0x1dc   :  { %v1514_v29 = vpop.eup %1513  ;;  %v581_v30 = vadd.f32 %v1913_v52, %v580_v28 }
 0x1dd   :  { %v1516_v31 = vpop.eup %1515  ;;  %1327 = vmatprep.mubr.f32.mxu0 %v1514_v29 }
 0x1de   :  { %1525 = vtanh.f32 %v581_v30  ;;  %v1261_v32 = vpop.f32.mrb[32].mxu1  ;;  %1328 = vmatmul.mubr.f32.gmra.mrb[24].mxu0 %v1516_v31 }
 0x1df   :  { %1527 = vtanh.f32 %v586_v27  ;;  %v596_v33 = vadd.f32 %v1261_v32, %v1913_v52  ;;  %v590_v34 = vpop.f32.mrb[33].mxu1 }
 0x1e0   :  { %v1518_v35 = vpop.eup %1517  ;;  %v591_v36 = vadd.f32 %v1913_v52, %v590_v34 }
 0x1e1   :  { %v1520_v37 = vpop.eup %1519  ;;  %1330 = vmatprep.mubr.f32.mxu0 %v1518_v35 }
 0x1e2   :  { %1529 = vtanh.f32 %v591_v36  ;;  %v1264_v38 = vpop.f32.mrb[34].mxu1  ;;  %1331 = vmatmul.mubr.f32.gmra.mrb[26].mxu0 %v1520_v37 }
 0x1e3   :  { %1531 = vtanh.f32 %v596_v33  ;;  %v606_v39 = vadd.f32 %v1264_v38, %v1913_v52  ;;  %v600_v40 = vpop.f32.mrb[35].mxu1 }
 0x1e4   :  { %v1522_v41 = vpop.eup %1521  ;;  %v601_v42 = vadd.f32 %v1913_v52, %v600_v40 }
 0x1e5   :  { %v1524_v43 = vpop.eup %1523  ;;  %1333 = vmatprep.mubr.f32.mxu0 %v1522_v41 }
 0x1e6   :  { %1533 = vtanh.f32 %v601_v42  ;;  %v1267_v10 = vpop.f32.mrb[36].mxu1  ;;  %1334 = vmatmul.mubr.f32.gmra.mrb[28].mxu0 %v1524_v43 }
 0x1e7   :  { %1535 = vtanh.f32 %v606_v39  ;;  %v616_v44 = vadd.f32 %v1267_v10, %v1913_v52  ;;  %v610_v45 = vpop.f32.mrb[37].mxu1 }
 0x1e8   :  { %v1526_v46 = vpop.eup %1525  ;;  %v611_v47 = vadd.f32 %v1913_v52, %v610_v45 }
 0x1e9   :  { %v1528_v48 = vpop.eup %1527  ;;  %1336 = vmatprep.mubr.f32.mxu0 %v1526_v46 }
 0x1ea   :  { %1537 = vtanh.f32 %v611_v47  ;;  %v1270_v49 = vpop.f32.mrb[38].mxu1  ;;  %1337 = vmatmul.mubr.f32.gmra.mrb[30].mxu0 %v1528_v48 }
 0x1eb   :  { %1539 = vtanh.f32 %v616_v44  ;;  %v626_v50 = vadd.f32 %v1270_v49, %v1913_v52  ;;  %v620_v51 = vpop.f32.mrb[39].mxu1 }
 0x1ec   :  { %v1530_v53 = vpop.eup %1529  ;;  %v621_v54 = vadd.f32 %v1913_v52, %v620_v51 }
 0x1ed   :  { %v1532_v55 = vpop.eup %1531  ;;  %1339 = vmatprep.mubr.f32.mxu0 %v1530_v53 }
 0x1ee   :  { %1541 = vtanh.f32 %v621_v54  ;;  %v1273_v56 = vpop.f32.mrb[40].mxu1  ;;  %1340 = vmatmul.mubr.f32.gmra.mrb[32].mxu0 %v1532_v55 }
 0x1ef   :  { %1543 = vtanh.f32 %v626_v50  ;;  %v636_v57 = vadd.f32 %v1273_v56, %v1913_v52  ;;  %v630_v58 = vpop.f32.mrb[41].mxu1 }
 0x1f0   :  { %v1534_v59 = vpop.eup %1533  ;;  %v631_v60 = vadd.f32 %v1913_v52, %v630_v58 }
 0x1f1   :  { %v1536_v61 = vpop.eup %1535  ;;  %1342 = vmatprep.mubr.f32.mxu0 %v1534_v59 }
 0x1f2   :  { %1545 = vtanh.f32 %v631_v60  ;;  %v1276_v62 = vpop.f32.mrb[42].mxu1  ;;  %1343 = vmatmul.mubr.f32.gmra.mrb[34].mxu0 %v1536_v61 }
 0x1f3   :  { %1547 = vtanh.f32 %v636_v57  ;;  %v646_v63 = vadd.f32 %v1276_v62, %v1913_v52  ;;  %v640_v0 = vpop.f32.mrb[43].mxu1 }
 0x1f4   :  { %v1538_v1 = vpop.eup %1537  ;;  %v641_v2 = vadd.f32 %v1913_v52, %v640_v0 }
 0x1f5   :  { %v1540_v3 = vpop.eup %1539  ;;  %1345 = vmatprep.mubr.f32.mxu0 %v1538_v1 }
 0x1f6   :  { %1549 = vtanh.f32 %v641_v2  ;;  %v1279_v4 = vpop.f32.mrb[44].mxu1  ;;  %1346 = vmatmul.mubr.f32.gmra.mrb[36].mxu0 %v1540_v3 }
 0x1f7   :  { %1551 = vtanh.f32 %v646_v63  ;;  %v656_v5 = vadd.f32 %v1279_v4, %v1913_v52  ;;  %v650_v6 = vpop.f32.mrb[45].mxu1 }
 0x1f8   :  { %v1542_v7 = vpop.eup %1541  ;;  %v651_v8 = vadd.f32 %v1913_v52, %v650_v6 }
 0x1f9   :  { %v1544_v9 = vpop.eup %1543  ;;  %1348 = vmatprep.mubr.f32.mxu0 %v1542_v7 }
 0x1fa   :  { %1553 = vtanh.f32 %v651_v8  ;;  %v1282_v11 = vpop.f32.mrb[46].mxu1  ;;  %1349 = vmatmul.mubr.f32.gmra.mrb[38].mxu0 %v1544_v9 }
 0x1fb   :  { %1555 = vtanh.f32 %v656_v5  ;;  %v666_v12 = vadd.f32 %v1282_v11, %v1913_v52  ;;  %v660_v13 = vpop.f32.mrb[47].mxu1 }
 0x1fc   :  { %v1546_v15 = vpop.eup %1545  ;;  %v661_v14 = vadd.f32 %v1913_v52, %v660_v13  ;;  %v1950_v52 = vld [vmem:[%s2118_s6] ss:$0 sm:$0xff] }
 0x1fd   :  { %v1548_v16 = vpop.eup %1547  ;;  %1351 = vmatprep.mubr.f32.mxu0 %v1546_v15 }
 0x1fe   :  { %1557 = vtanh.f32 %v661_v14  ;;  %1352 = vmatmul.mubr.f32.gmra.mrb[40].mxu0 %v1548_v16 }
 0x1ff   :  { %1559 = vtanh.f32 %v666_v12 }
 0x200   :  { %v1550_v17 = vpop.eup %1549 }
 0x201   :  { %v1552_v18 = vpop.eup %1551  ;;  %1354 = vmatprep.mubr.f32.mxu0 %v1550_v17 }
 0x202   :  { %1355 = vmatmul.mubr.f32.gmra.mrb[42].mxu0 %v1552_v18 }
 0x204   :  { %v1554_v19 = vpop.eup %1553 }
 0x205   :  { %v1556_v20 = vpop.eup %1555  ;;  %1357 = vmatprep.mubr.f32.mxu0 %v1554_v19 }
 0x206   :  { %1358 = vmatmul.mubr.f32.gmra.mrb[44].mxu0 %v1556_v20 }
 0x208   :  { %v1558_v21 = vpop.eup %1557 }
 0x209   :  { %v1560_v22 = vpop.eup %1559  ;;  %1360 = vmatprep.mubr.f32.mxu0 %v1558_v21 }
 0x20a   :  { %1361 = vmatmul.mubr.f32.gmra.mrb[46].mxu0 %v1560_v22 }
 0x2a1   :  { %v1317_v23 = vpop.f32.mrb[16].mxu0 }
 0x2a2   :  { %v796_v24 = vadd.f32 %v1317_v23, %v1950_v52  ;;  %v790_v25 = vpop.f32.mrb[17].mxu0 }
 0x2a3   :  { %v791_v26 = vadd.f32 %v1950_v52, %v790_v25 }
 0x2a4   :  { %951 = vst.msk [vmem:[%s2119_s7 + $0x8] sm:$0xff] %vm949_vm1, %v796_v24 }
 0x2a5   :  { %950 = vst.msk [vmem:[%s2119_s7] sm:$0xff] %vm949_vm1, %v791_v26  ;;  %v1320_v27 = vpop.f32.mrb[18].mxu0 }
 0x2a6   :  { %v806_v28 = vadd.f32 %v1320_v27, %v1950_v52  ;;  %v800_v29 = vpop.f32.mrb[19].mxu0 }
 0x2a7   :  { %v801_v30 = vadd.f32 %v1950_v52, %v800_v29 }
 0x2a8   :  { %953 = vst.msk [vmem:[%s2119_s7 + $0x18] sm:$0xff] %vm949_vm1, %v806_v28 }
 0x2a9   :  { %952 = vst.msk [vmem:[%s2119_s7 + $0x10] sm:$0xff] %vm949_vm1, %v801_v30  ;;  %v1323_v31 = vpop.f32.mrb[20].mxu0 }
 0x2aa   :  { %v816_v32 = vadd.f32 %v1323_v31, %v1950_v52  ;;  %v810_v33 = vpop.f32.mrb[21].mxu0 }
 0x2ab   :  { %v811_v34 = vadd.f32 %v1950_v52, %v810_v33 }
 0x2ac   :  { %955 = vst.msk [vmem:[%s2119_s7 + $0x28] sm:$0xff] %vm949_vm1, %v816_v32 }
 0x2ad   :  { %954 = vst.msk [vmem:[%s2119_s7 + $0x20] sm:$0xff] %vm949_vm1, %v811_v34  ;;  %v1326_v35 = vpop.f32.mrb[22].mxu0 }
 0x2ae   :  { %v826_v36 = vadd.f32 %v1326_v35, %v1950_v52  ;;  %v820_v37 = vpop.f32.mrb[23].mxu0 }
 0x2af   :  { %v821_v38 = vadd.f32 %v1950_v52, %v820_v37 }
 0x2b0   :  { %957 = vst.msk [vmem:[%s2119_s7 + $0x38] sm:$0xff] %vm949_vm1, %v826_v36 }
 0x2b1   :  { %956 = vst.msk [vmem:[%s2119_s7 + $0x30] sm:$0xff] %vm949_vm1, %v821_v38  ;;  %v1329_v39 = vpop.f32.mrb[24].mxu0 }
 0x2b2   :  { %v836_v40 = vadd.f32 %v1329_v39, %v1950_v52  ;;  %v830_v41 = vpop.f32.mrb[25].mxu0 }
 0x2b3   :  { %v831_v42 = vadd.f32 %v1950_v52, %v830_v41 }
 0x2b4   :  { %959 = vst.msk [vmem:[%s2119_s7 + $0x48] sm:$0xff] %vm949_vm1, %v836_v40 }
 0x2b5   :  { %958 = vst.msk [vmem:[%s2119_s7 + $0x40] sm:$0xff] %vm949_vm1, %v831_v42  ;;  %v1332_v43 = vpop.f32.mrb[26].mxu0 }
 0x2b6   :  { %v846_v10 = vadd.f32 %v1332_v43, %v1950_v52  ;;  %v840_v44 = vpop.f32.mrb[27].mxu0 }
 0x2b7   :  { %v841_v45 = vadd.f32 %v1950_v52, %v840_v44 }
 0x2b8   :  { %961 = vst.msk [vmem:[%s2119_s7 + $0x58] sm:$0xff] %vm949_vm1, %v846_v10 }
 0x2b9   :  { %960 = vst.msk [vmem:[%s2119_s7 + $0x50] sm:$0xff] %vm949_vm1, %v841_v45  ;;  %v1335_v46 = vpop.f32.mrb[28].mxu0 }
 0x2ba   :  { %v856_v47 = vadd.f32 %v1335_v46, %v1950_v52  ;;  %v850_v48 = vpop.f32.mrb[29].mxu0 }
 0x2bb   :  { %v851_v49 = vadd.f32 %v1950_v52, %v850_v48 }
 0x2bc   :  { %963 = vst.msk [vmem:[%s2119_s7 + $0x68] sm:$0xff] %vm949_vm1, %v856_v47 }
 0x2bd   :  { %962 = vst.msk [vmem:[%s2119_s7 + $0x60] sm:$0xff] %vm949_vm1, %v851_v49  ;;  %v1338_v50 = vpop.f32.mrb[30].mxu0 }
 0x2be   :  { %v866_v51 = vadd.f32 %v1338_v50, %v1950_v52  ;;  %v860_v53 = vpop.f32.mrb[31].mxu0 }
 0x2bf   :  { %v861_v54 = vadd.f32 %v1950_v52, %v860_v53 }
 0x2c0   :  { %965 = vst.msk [vmem:[%s2119_s7 + $0x78] sm:$0xff] %vm949_vm1, %v866_v51 }
 0x2c1   :  { %964 = vst.msk [vmem:[%s2119_s7 + $0x70] sm:$0xff] %vm949_vm1, %v861_v54  ;;  %v1341_v55 = vpop.f32.mrb[32].mxu0 }
 0x2c2   :  { %v876_v56 = vadd.f32 %v1341_v55, %v1950_v52  ;;  %v870_v57 = vpop.f32.mrb[33].mxu0 }
 0x2c3   :  { %v871_v58 = vadd.f32 %v1950_v52, %v870_v57 }
 0x2c4   :  { %967 = vst.msk [vmem:[%s2119_s7 + $0x88] sm:$0xff] %vm949_vm1, %v876_v56 }
 0x2c5   :  { %966 = vst.msk [vmem:[%s2119_s7 + $0x80] sm:$0xff] %vm949_vm1, %v871_v58  ;;  %v1344_v59 = vpop.f32.mrb[34].mxu0 }
 0x2c6   :  { %v886_v60 = vadd.f32 %v1344_v59, %v1950_v52  ;;  %v880_v61 = vpop.f32.mrb[35].mxu0 }
 0x2c7   :  { %v881_v62 = vadd.f32 %v1950_v52, %v880_v61 }
 0x2c8   :  { %969 = vst.msk [vmem:[%s2119_s7 + $0x98] sm:$0xff] %vm949_vm1, %v886_v60 }
 0x2c9   :  { %968 = vst.msk [vmem:[%s2119_s7 + $0x90] sm:$0xff] %vm949_vm1, %v881_v62  ;;  %v1347_v63 = vpop.f32.mrb[36].mxu0 }
 0x2ca   :  { %v896_v0 = vadd.f32 %v1347_v63, %v1950_v52  ;;  %v890_v1 = vpop.f32.mrb[37].mxu0 }
 0x2cb   :  { %v891_v2 = vadd.f32 %v1950_v52, %v890_v1 }
 0x2cc   :  { %971 = vst.msk [vmem:[%s2119_s7 + $0xa8] sm:$0xff] %vm949_vm1, %v896_v0 }
 0x2cd   :  { %970 = vst.msk [vmem:[%s2119_s7 + $0xa0] sm:$0xff] %vm949_vm1, %v891_v2  ;;  %v1350_v3 = vpop.f32.mrb[38].mxu0 }
 0x2ce   :  { %v906_v4 = vadd.f32 %v1350_v3, %v1950_v52  ;;  %v900_v5 = vpop.f32.mrb[39].mxu0 }
 0x2cf   :  { %v901_v6 = vadd.f32 %v1950_v52, %v900_v5 }
 0x2d0   :  { %973 = vst.msk [vmem:[%s2119_s7 + $0xb8] sm:$0xff] %vm949_vm1, %v906_v4 }
 0x2d1   :  { %972 = vst.msk [vmem:[%s2119_s7 + $0xb0] sm:$0xff] %vm949_vm1, %v901_v6  ;;  %v1353_v7 = vpop.f32.mrb[40].mxu0 }
 0x2d2   :  { %v916_v8 = vadd.f32 %v1353_v7, %v1950_v52  ;;  %v910_v9 = vpop.f32.mrb[41].mxu0 }
 0x2d3   :  { %v911_v11 = vadd.f32 %v1950_v52, %v910_v9 }
 0x2d4   :  { %975 = vst.msk [vmem:[%s2119_s7 + $0xc8] sm:$0xff] %vm949_vm1, %v916_v8 }
 0x2d5   :  { %974 = vst.msk [vmem:[%s2119_s7 + $0xc0] sm:$0xff] %vm949_vm1, %v911_v11  ;;  %v1356_v12 = vpop.f32.mrb[42].mxu0 }
 0x2d6   :  { %v926_v13 = vadd.f32 %v1356_v12, %v1950_v52  ;;  %v920_v15 = vpop.f32.mrb[43].mxu0 }
 0x2d7   :  { %v921_v14 = vadd.f32 %v1950_v52, %v920_v15 }
 0x2d8   :  { %977 = vst.msk [vmem:[%s2119_s7 + $0xd8] sm:$0xff] %vm949_vm1, %v926_v13 }
 0x2d9   :  { %976 = vst.msk [vmem:[%s2119_s7 + $0xd0] sm:$0xff] %vm949_vm1, %v921_v14  ;;  %v1359_v16 = vpop.f32.mrb[44].mxu0 }
 0x2da   :  { %v936_v17 = vadd.f32 %v1359_v16, %v1950_v52  ;;  %v930_v18 = vpop.f32.mrb[45].mxu0 }
 0x2db   :  { %v931_v19 = vadd.f32 %v1950_v52, %v930_v18 }
 0x2dc   :  { %979 = vst.msk [vmem:[%s2119_s7 + $0xe8] sm:$0xff] %vm949_vm1, %v936_v17 }
 0x2dd   :  { %978 = vst.msk [vmem:[%s2119_s7 + $0xe0] sm:$0xff] %vm949_vm1, %v931_v19  ;;  %v1362_v20 = vpop.f32.mrb[46].mxu0 }
 0x2de   :  { %v946_v21 = vadd.f32 %v1362_v20, %v1950_v52  ;;  %v940_v22 = vpop.f32.mrb[47].mxu0 }
 0x2df   :  { %v941_v23 = vadd.f32 %v1950_v52, %v940_v22 }
 0x2e0   :  { %981 = vst.msk [vmem:[%s2119_s7 + $0xf8] sm:$0xff] %vm949_vm1, %v946_v21 }
 0x2e1   :  { %980 = vst.msk [vmem:[%s2119_s7 + $0xf0] sm:$0xff] %vm949_vm1, %v941_v23 }

</bundles_post_ra>
